<compile_context>
chip_gen: v5e
topology: v5e:2x2
jax: 0.10.0
libtpu: 0.0.40
codegen_flags: <defaults>
</compile_context>

<pallas_src>
import math
import numpy as np

import jax
import jax.numpy as jnp
from jax.experimental import pallas as pl
from jax.experimental.pallas import tpu as pltpu


def _encoder_attn_kernel(x_ref, wt_ref, b_ref, m_ref, o_ref, feats_ref, acc_ref):
    # x_ref:     (B, Cin, THW)    channels-first block of B images (lanes = HW tile), f32
    # wt_ref:    (Cout, Cin)      1x1-conv weight, transposed, f32
    # b_ref:     (Cout, 1)        bias column, f32
    # m_ref:     (SS, THW)        adaptive-avg-pool matrix tile, bf16
    # o_ref:     (1, SS, B*Cout)  pooled output slab for this batch block, f32
    # feats_ref: (B*Cout, THW)    VMEM scratch: relu(w.T @ x + b), bf16
    # acc_ref:   (SS, B*Cout)     VMEM scratch: f32 pool accumulator over HW tiles
    k = pl.program_id(1)
    B, Cin, THW = x_ref.shape
    Cout = wt_ref.shape[0]

    @pl.when(k == 0)
    def _():
        acc_ref[...] = jnp.zeros_like(acc_ref)

    # Hoisted broadcasts of grid-invariant operands: once per grid step, not per
    # (image, channel) pair (JAX does not CSE broadcast_in_dim).
    bias_b = jnp.broadcast_to(b_ref[...], (Cout, THW))
    w_cols = [jnp.broadcast_to(wt_ref[:, c:c + 1], (Cout, THW)) for c in range(Cin)]

    # Projection + bias + ReLU on the VPU: K = Cin (3/4) is far too shallow for
    # the MXU, so unroll a broadcast-FMA over the input channels (f32 math,
    # bf16 store into the feats scratch).
    for b in range(B):                               # static unroll, B is small
        x_b = x_ref[b]                               # (Cin, THW)
        acc = bias_b
        for c in range(Cin):
            acc = acc + w_cols[c] * x_b[c:c + 1, :]
        feats_ref[b * Cout:(b + 1) * Cout, :] = (
            jnp.maximum(acc, 0.0).astype(feats_ref.dtype))

    # Adaptive-average-pool partial sum for this HW tile as ONE MXU matmul,
    # contracting both last dims (no transpose pass, no extra feats copy):
    #   (SS, THW) . (B*Cout, THW)^T -> (SS, B*Cout), f32 accumulation.
    acc_ref[...] += jax.lax.dot_general(
        m_ref[...], feats_ref[...],
        dimension_numbers=(((1,), (1,)), ((), ())),
        preferred_element_type=jnp.float32)

    @pl.when(k == pl.num_programs(1) - 1)
    def _():
        o_ref[0] = acc_ref[...].astype(o_ref.dtype)


def build_adaptive_pool_matrix(H, W, S):
    """(S*S, H*W) matrix reproducing torch.nn.AdaptiveAvgPool2d((S, S)) exactly."""
    M = np.zeros((S * S, H * W), dtype=np.float32)
    for i in range(S):
        h0 = (i * H) // S
        h1 = -(-((i + 1) * H) // S)          # ceil
        for j in range(S):
            w0 = (j * W) // S
            w1 = -(-((j + 1) * W) // S)      # ceil
            cnt = float((h1 - h0) * (w1 - w0))
            for h in range(h0, h1):
                for w in range(w0, w1):
                    M[i * S + j, h * W + w] = 1.0 / cnt
    return jnp.asarray(M)


def _vmem_budget_bytes():
    """Device-aware VMEM budget: ~48 MiB on v7x (64 MiB phys), ~96 MiB on v5e/v6e."""
    cap = 64 * 1024 * 1024            # conservative fallback (covers v7x)
    try:
        info = pltpu.get_tpu_info()
        cap = int(getattr(info, "vmem_capacity_bytes", cap))
    except Exception:
        pass
    return min((cap * 3) // 4, 100 * 1024 * 1024)


def _pick_batch_block(N, Cout, max_block=8):
    """Pick B so B*Cout is a multiple of 128 (lane-dense output, full MXU width)."""
    lane_mult = 128 // math.gcd(128, Cout)
    if lane_mult > max_block:
        return max(1, min(max_block, N))
    b = -(-min(max(N, 1), max_block) // lane_mult) * lane_mult
    return min(max_block, max(lane_mult, b))


def _pick_hw_tile(HW, B, Cin, Cout, SS, budget_bytes):
    """Largest HW tile (multiple of 128 dividing HW, or full HW) fitting the VMEM budget."""
    def vmem_need(thw):
        return (2 * B * Cin * thw * 4        # x tile, double-buffered f32
                + B * Cout * thw * 2         # feats scratch, bf16
                + 2 * SS * thw * 2           # pool-matrix tile, bf16 (worst case 2 bufs)
                + SS * B * Cout * 4          # f32 pool accumulator
                + 2 * SS * B * Cout * 4)     # output slab, double-buffered f32
    if vmem_need(HW) <= budget_bytes or HW % 128 != 0:
        # TODO(synk): if HW is not 128-aligned and does not fit, pad HW to 128.
        return HW
    fits = [t for t in range(128, HW, 128) if HW % t == 0 and vmem_need(t) <= budget_bytes]
    return max(fits) if fits else 128


def encoder_attn_forward(images_nchw, w, b, enc_image_size,
                         batch_block=None, hw_tile=None):
    """images_nchw: (N, Cin, H, W) -> (N, S, S, Cout)  (== pool(feat).permute(0,2,3,1))."""
    N, Cin, H, W = images_nchw.shape
    Cout = w.shape[1]
    S = enc_image_size
    HW = H * W
    SS = S * S

    budget = _vmem_budget_bytes()
    B = batch_block if batch_block is not None else _pick_batch_block(N, Cout)
    THW = hw_tile if hw_tile is not None else _pick_hw_tile(HW, B, Cin, Cout, SS, budget)
    assert HW % THW == 0, (HW, THW)
    KT = HW // THW
    G = -(-N // B)                  # batch grid steps
    N_pad = G * B

    # Channels-first, spatial flattened: a free reshape of NCHW (no HBM transpose),
    # every loaded row is lane-dense (HW on the 128-lane axis).
    x = images_nchw.reshape(N, Cin, HW).astype(jnp.float32)
    if N_pad != N:
        x = jnp.pad(x, ((0, N_pad - N), (0, 0), (0, 0)))

    wt = jnp.asarray(w, jnp.float32).T                       # (Cout, Cin)
    b_col = jnp.asarray(b, jnp.float32).reshape(Cout, 1)
    M = build_adaptive_pool_matrix(H, W, S).astype(jnp.bfloat16)   # (SS, HW) bf16

    invariant = dict(pipeline_mode=pl.Buffered(1))           # single-buffer invariants
    m_kwargs = invariant if KT == 1 else {}                  # M varies with k when tiled

    out_raw = pl.pallas_call(
        _encoder_attn_kernel,
        out_shape=jax.ShapeDtypeStruct((G, SS, B * Cout), jnp.float32),
        grid_spec=pltpu.PrefetchScalarGridSpec(
            num_scalar_prefetch=0,
            grid=(G, KT),
            in_specs=[
                pl.BlockSpec((B, Cin, THW), lambda n, k: (n, 0, k)),
                pl.BlockSpec((Cout, Cin), lambda n, k: (0, 0), **invariant),
                pl.BlockSpec((Cout, 1), lambda n, k: (0, 0), **invariant),
                pl.BlockSpec((SS, THW), lambda n, k: (0, k), **m_kwargs),
            ],
            out_specs=pl.BlockSpec((1, SS, B * Cout), lambda n, k: (n, 0, 0)),
            scratch_shapes=[
                pltpu.VMEM((B * Cout, THW), jnp.bfloat16),   # relu'd feats (this HW tile)
                pltpu.VMEM((SS, B * Cout), jnp.float32),     # pool accumulator
            ],
        ),
        compiler_params=pltpu.CompilerParams(
            dimension_semantics=("parallel", "arbitrary"),
            vmem_limit_bytes=budget,
        ),
    )(x, wt, b_col, M)

    # (G, SS, B*Cout) -> (N, S, S, Cout): layout plumbing on a tiny output slab.
    out = (out_raw.reshape(G, SS, B, Cout)
                  .transpose(0, 2, 1, 3)
                  .reshape(N_pad, SS, Cout))
    return out[:N].reshape(N, S, S, Cout)


def encoder_attn_reference(images_nchw, w, b, enc_image_size):
    """Pure-JAX f32 reference of the same forward."""
    N, Cin, H, W = images_nchw.shape
    Cout = w.shape[1]
    S = enc_image_size
    x = images_nchw.reshape(N, Cin, H * W).astype(jnp.float32)
    feats = jnp.maximum(jnp.einsum("ncp,cd->npd", x, w) + b[None, None, :], 0.0)
    M = build_adaptive_pool_matrix(H, W, S)
    pooled = jnp.einsum("qp,npd->nqd", M, feats)
    return pooled.reshape(N, S, S, Cout)


if __name__ == "__main__":
    # small shapes consistent with the module's forward
    N, Cin, H, W = 2, 4, 16, 16        # input images (NCHW, like PyTorch)
    Cout = 32                          # backbone feature channels (stand-in)
    ENC_IMAGE_SIZE = 4                 # config.encoded_img_size

    key = jax.random.PRNGKey(0)
    k_img, k_w, k_b = jax.random.split(key, 3)
    images = jax.random.normal(k_img, (N, Cin, H, W), dtype=jnp.float32)
    w = jax.random.normal(k_w, (Cin, Cout), dtype=jnp.float32) * 0.1
    b = jax.random.normal(k_b, (Cout,), dtype=jnp.float32) * 0.01

    ref = encoder_attn_reference(images, w, b, ENC_IMAGE_SIZE)

    out = jax.block_until_ready(encoder_attn_forward(images, w, b, ENC_IMAGE_SIZE))
    assert out.shape == (N, ENC_IMAGE_SIZE, ENC_IMAGE_SIZE, Cout), out.shape
    np.testing.assert_allclose(np.asarray(out), np.asarray(ref), rtol=1e-2, atol=5e-3)

    # Also exercise the HW-reduction-tiled (v7x-style) path: multi-step accumulate
    # over the HW grid axis plus padded batch block.
    out_tiled = jax.block_until_ready(
        encoder_attn_forward(images, w, b, ENC_IMAGE_SIZE, batch_block=4, hw_tile=128))
    np.testing.assert_allclose(np.asarray(out_tiled), np.asarray(ref), rtol=1e-2, atol=5e-3)

    print("KERNEL_OK")
</pallas_src>

<mosaic_0001>
module attributes {stable_mosaic.version = 11 : i64} {
  func.func @_encoder_attn_kernel(%arg0: i32, %arg1: i32, %arg2: memref<4x4x256xf32, #tpu.memory_space<vmem>>, %arg3: memref<32x4xf32, #tpu.memory_space<vmem>>, %arg4: memref<32x1xf32, #tpu.memory_space<vmem>>, %arg5: memref<16x256xbf16, #tpu.memory_space<vmem>>, %arg6: memref<1x16x128xf32, #tpu.memory_space<vmem>>, %arg7: memref<128x256xbf16, #tpu.memory_space<vmem>>, %arg8: memref<16x128xf32, #tpu.memory_space<vmem>>) attributes {dimension_semantics = [#tpu.dimension_semantics<parallel>, #tpu.dimension_semantics<arbitrary>], iteration_bounds = array<i64: 1, 1>, scalar_prefetch = 0 : i64, scratch_operands = 2 : i64, tpu.core_type = #tpu.core_type<tc>, window_params = [{transform_indices = @transform_0, window_bounds = array<i64: 4, 4, 256>}, {pipeline_mode = #tpu.pipeline_mode<synchronous>, transform_indices = @transform_1, window_bounds = array<i64: 32, 4>}, {pipeline_mode = #tpu.pipeline_mode<synchronous>, transform_indices = @transform_2, window_bounds = array<i64: 32, 1>}, {pipeline_mode = #tpu.pipeline_mode<synchronous>, transform_indices = @transform_3, window_bounds = array<i64: 16, 256>}, {transform_indices = @transform_4, window_bounds = array<i64: 1, 16, 128>}]} {
    %c0_i32 = arith.constant 0 : i32
    %0 = arith.cmpi eq, %arg1, %c0_i32 : i32
    %1 = arith.extui %0 : i1 to i32
    %c0_i32_0 = arith.constant 0 : i32
    %2 = arith.cmpi ne, %1, %c0_i32_0 : i32
    scf.if %2 {
      %cst_38 = arith.constant 0.000000e+00 : f32
      %115 = vector.broadcast %cst_38 : f32 to vector<16x128xf32>
      %c0_39 = arith.constant 0 : index
      %c0_40 = arith.constant 0 : index
      %116 = vector.load %arg8[%c0_39, %c0_40] : memref<16x128xf32, #tpu.memory_space<vmem>>, vector<16x128xf32>
      tpu.vector_store %arg8[%c0_39, %c0_40], %115 {strides = array<i32>} : memref<16x128xf32, #tpu.memory_space<vmem>>, vector<16x128xf32>,
    } else {
    }
    %c0 = arith.constant 0 : index
    %c0_1 = arith.constant 0 : index
    %3 = vector.load %arg4[%c0, %c0_1] : memref<32x1xf32, #tpu.memory_space<vmem>>, vector<32x1xf32>
    %4 = vector.shape_cast %3 : vector<32x1xf32> to vector<32x1xf32>
    %5 = vector.broadcast %4 : vector<32x1xf32> to vector<32x256xf32>
    %c0_2 = arith.constant 0 : index
    %c0_3 = arith.constant 0 : index
    %6 = vector.load %arg3[%c0_2, %c0_3] : memref<32x4xf32, #tpu.memory_space<vmem>>, vector<32x1xf32>
    %7 = vector.shape_cast %6 : vector<32x1xf32> to vector<32x1xf32>
    %8 = vector.broadcast %7 : vector<32x1xf32> to vector<32x256xf32>
    %c0_4 = arith.constant 0 : index
    %c1 = arith.constant 1 : index
    %9 = vector.load %arg3[%c0_4, %c1] : memref<32x4xf32, #tpu.memory_space<vmem>>, vector<32x1xf32>
    %10 = vector.shape_cast %9 : vector<32x1xf32> to vector<32x1xf32>
    %11 = vector.broadcast %10 : vector<32x1xf32> to vector<32x256xf32>
    %c0_5 = arith.constant 0 : index
    %c2 = arith.constant 2 : index
    %12 = vector.load %arg3[%c0_5, %c2] : memref<32x4xf32, #tpu.memory_space<vmem>>, vector<32x1xf32>
    %13 = vector.shape_cast %12 : vector<32x1xf32> to vector<32x1xf32>
    %14 = vector.broadcast %13 : vector<32x1xf32> to vector<32x256xf32>
    %c0_6 = arith.constant 0 : index
    %c3 = arith.constant 3 : index
    %15 = vector.load %arg3[%c0_6, %c3] : memref<32x4xf32, #tpu.memory_space<vmem>>, vector<32x1xf32>
    %16 = vector.shape_cast %15 : vector<32x1xf32> to vector<32x1xf32>
    %17 = vector.broadcast %16 : vector<32x1xf32> to vector<32x256xf32>
    %c0_7 = arith.constant 0 : index
    %c0_8 = arith.constant 0 : index
    %c0_9 = arith.constant 0 : index
    %18 = vector.load %arg2[%c0_7, %c0_8, %c0_9] : memref<4x4x256xf32, #tpu.memory_space<vmem>>, vector<1x4x256xf32>
    %19 = vector.shape_cast %18 : vector<1x4x256xf32> to vector<4x256xf32>
    %20 = vector.extract_strided_slice %19 {offsets = [0, 0], sizes = [1, 256], strides = [1, 1]} : vector<4x256xf32> to vector<1x256xf32>
    %21 = vector.broadcast %20 : vector<1x256xf32> to vector<32x256xf32>
    %22 = arith.mulf %8, %21 : vector<32x256xf32>
    %23 = arith.addf %5, %22 : vector<32x256xf32>
    %24 = vector.extract_strided_slice %19 {offsets = [1, 0], sizes = [1, 256], strides = [1, 1]} : vector<4x256xf32> to vector<1x256xf32>
    %25 = vector.broadcast %24 : vector<1x256xf32> to vector<32x256xf32>
    %26 = arith.mulf %11, %25 : vector<32x256xf32>
    %27 = arith.addf %23, %26 : vector<32x256xf32>
    %28 = vector.extract_strided_slice %19 {offsets = [2, 0], sizes = [1, 256], strides = [1, 1]} : vector<4x256xf32> to vector<1x256xf32>
    %29 = vector.broadcast %28 : vector<1x256xf32> to vector<32x256xf32>
    %30 = arith.mulf %14, %29 : vector<32x256xf32>
    %31 = arith.addf %27, %30 : vector<32x256xf32>
    %32 = vector.extract_strided_slice %19 {offsets = [3, 0], sizes = [1, 256], strides = [1, 1]} : vector<4x256xf32> to vector<1x256xf32>
    %33 = vector.broadcast %32 : vector<1x256xf32> to vector<32x256xf32>
    %34 = arith.mulf %17, %33 : vector<32x256xf32>
    %35 = arith.addf %31, %34 : vector<32x256xf32>
    %cst = arith.constant 0.000000e+00 : f32
    %36 = vector.broadcast %cst : f32 to vector<32x256xf32>
    %37 = arith.maximumf %35, %36 : vector<32x256xf32>
    %38 = arith.truncf %37 : vector<32x256xf32> to vector<32x256xbf16>
    %c0_10 = arith.constant 0 : index
    %c0_11 = arith.constant 0 : index
    %39 = vector.load %arg7[%c0_10, %c0_11] : memref<128x256xbf16, #tpu.memory_space<vmem>>, vector<32x256xbf16>
    tpu.vector_store %arg7[%c0_10, %c0_11], %38 {strides = array<i32>} : memref<128x256xbf16, #tpu.memory_space<vmem>>, vector<32x256xbf16>,
    %c1_12 = arith.constant 1 : index
    %c0_13 = arith.constant 0 : index
    %c0_14 = arith.constant 0 : index
    %40 = vector.load %arg2[%c1_12, %c0_13, %c0_14] : memref<4x4x256xf32, #tpu.memory_space<vmem>>, vector<1x4x256xf32>
    %41 = vector.shape_cast %40 : vector<1x4x256xf32> to vector<4x256xf32>
    %42 = vector.extract_strided_slice %41 {offsets = [0, 0], sizes = [1, 256], strides = [1, 1]} : vector<4x256xf32> to vector<1x256xf32>
    %43 = vector.broadcast %42 : vector<1x256xf32> to vector<32x256xf32>
    %44 = arith.mulf %8, %43 : vector<32x256xf32>
    %45 = arith.addf %5, %44 : vector<32x256xf32>
    %46 = vector.extract_strided_slice %41 {offsets = [1, 0], sizes = [1, 256], strides = [1, 1]} : vector<4x256xf32> to vector<1x256xf32>
    %47 = vector.broadcast %46 : vector<1x256xf32> to vector<32x256xf32>
    %48 = arith.mulf %11, %47 : vector<32x256xf32>
    %49 = arith.addf %45, %48 : vector<32x256xf32>
    %50 = vector.extract_strided_slice %41 {offsets = [2, 0], sizes = [1, 256], strides = [1, 1]} : vector<4x256xf32> to vector<1x256xf32>
    %51 = vector.broadcast %50 : vector<1x256xf32> to vector<32x256xf32>
    %52 = arith.mulf %14, %51 : vector<32x256xf32>
    %53 = arith.addf %49, %52 : vector<32x256xf32>
    %54 = vector.extract_strided_slice %41 {offsets = [3, 0], sizes = [1, 256], strides = [1, 1]} : vector<4x256xf32> to vector<1x256xf32>
    %55 = vector.broadcast %54 : vector<1x256xf32> to vector<32x256xf32>
    %56 = arith.mulf %17, %55 : vector<32x256xf32>
    %57 = arith.addf %53, %56 : vector<32x256xf32>
    %cst_15 = arith.constant 0.000000e+00 : f32
    %58 = vector.broadcast %cst_15 : f32 to vector<32x256xf32>
    %59 = arith.maximumf %57, %58 : vector<32x256xf32>
    %60 = arith.truncf %59 : vector<32x256xf32> to vector<32x256xbf16>
    %c32 = arith.constant 32 : index
    %c0_16 = arith.constant 0 : index
    %61 = vector.load %arg7[%c32, %c0_16] : memref<128x256xbf16, #tpu.memory_space<vmem>>, vector<32x256xbf16>
    tpu.vector_store %arg7[%c32, %c0_16], %60 {strides = array<i32>} : memref<128x256xbf16, #tpu.memory_space<vmem>>, vector<32x256xbf16>,
    %c2_17 = arith.constant 2 : index
    %c0_18 = arith.constant 0 : index
    %c0_19 = arith.constant 0 : index
    %62 = vector.load %arg2[%c2_17, %c0_18, %c0_19] : memref<4x4x256xf32, #tpu.memory_space<vmem>>, vector<1x4x256xf32>
    %63 = vector.shape_cast %62 : vector<1x4x256xf32> to vector<4x256xf32>
    %64 = vector.extract_strided_slice %63 {offsets = [0, 0], sizes = [1, 256], strides = [1, 1]} : vector<4x256xf32> to vector<1x256xf32>
    %65 = vector.broadcast %64 : vector<1x256xf32> to vector<32x256xf32>
    %66 = arith.mulf %8, %65 : vector<32x256xf32>
    %67 = arith.addf %5, %66 : vector<32x256xf32>
    %68 = vector.extract_strided_slice %63 {offsets = [1, 0], sizes = [1, 256], strides = [1, 1]} : vector<4x256xf32> to vector<1x256xf32>
    %69 = vector.broadcast %68 : vector<1x256xf32> to vector<32x256xf32>
    %70 = arith.mulf %11, %69 : vector<32x256xf32>
    %71 = arith.addf %67, %70 : vector<32x256xf32>
    %72 = vector.extract_strided_slice %63 {offsets = [2, 0], sizes = [1, 256], strides = [1, 1]} : vector<4x256xf32> to vector<1x256xf32>
    %73 = vector.broadcast %72 : vector<1x256xf32> to vector<32x256xf32>
    %74 = arith.mulf %14, %73 : vector<32x256xf32>
    %75 = arith.addf %71, %74 : vector<32x256xf32>
    %76 = vector.extract_strided_slice %63 {offsets = [3, 0], sizes = [1, 256], strides = [1, 1]} : vector<4x256xf32> to vector<1x256xf32>
    %77 = vector.broadcast %76 : vector<1x256xf32> to vector<32x256xf32>
    %78 = arith.mulf %17, %77 : vector<32x256xf32>
    %79 = arith.addf %75, %78 : vector<32x256xf32>
    %cst_20 = arith.constant 0.000000e+00 : f32
    %80 = vector.broadcast %cst_20 : f32 to vector<32x256xf32>
    %81 = arith.maximumf %79, %80 : vector<32x256xf32>
    %82 = arith.truncf %81 : vector<32x256xf32> to vector<32x256xbf16>
    %c64 = arith.constant 64 : index
    %c0_21 = arith.constant 0 : index
    %83 = vector.load %arg7[%c64, %c0_21] : memref<128x256xbf16, #tpu.memory_space<vmem>>, vector<32x256xbf16>
    tpu.vector_store %arg7[%c64, %c0_21], %82 {strides = array<i32>} : memref<128x256xbf16, #tpu.memory_space<vmem>>, vector<32x256xbf16>,
    %c3_22 = arith.constant 3 : index
    %c0_23 = arith.constant 0 : index
    %c0_24 = arith.constant 0 : index
    %84 = vector.load %arg2[%c3_22, %c0_23, %c0_24] : memref<4x4x256xf32, #tpu.memory_space<vmem>>, vector<1x4x256xf32>
    %85 = vector.shape_cast %84 : vector<1x4x256xf32> to vector<4x256xf32>
    %86 = vector.extract_strided_slice %85 {offsets = [0, 0], sizes = [1, 256], strides = [1, 1]} : vector<4x256xf32> to vector<1x256xf32>
    %87 = vector.broadcast %86 : vector<1x256xf32> to vector<32x256xf32>
    %88 = arith.mulf %8, %87 : vector<32x256xf32>
    %89 = arith.addf %5, %88 : vector<32x256xf32>
    %90 = vector.extract_strided_slice %85 {offsets = [1, 0], sizes = [1, 256], strides = [1, 1]} : vector<4x256xf32> to vector<1x256xf32>
    %91 = vector.broadcast %90 : vector<1x256xf32> to vector<32x256xf32>
    %92 = arith.mulf %11, %91 : vector<32x256xf32>
    %93 = arith.addf %89, %92 : vector<32x256xf32>
    %94 = vector.extract_strided_slice %85 {offsets = [2, 0], sizes = [1, 256], strides = [1, 1]} : vector<4x256xf32> to vector<1x256xf32>
    %95 = vector.broadcast %94 : vector<1x256xf32> to vector<32x256xf32>
    %96 = arith.mulf %14, %95 : vector<32x256xf32>
    %97 = arith.addf %93, %96 : vector<32x256xf32>
    %98 = vector.extract_strided_slice %85 {offsets = [3, 0], sizes = [1, 256], strides = [1, 1]} : vector<4x256xf32> to vector<1x256xf32>
    %99 = vector.broadcast %98 : vector<1x256xf32> to vector<32x256xf32>
    %100 = arith.mulf %17, %99 : vector<32x256xf32>
    %101 = arith.addf %97, %100 : vector<32x256xf32>
    %cst_25 = arith.constant 0.000000e+00 : f32
    %102 = vector.broadcast %cst_25 : f32 to vector<32x256xf32>
    %103 = arith.maximumf %101, %102 : vector<32x256xf32>
    %104 = arith.truncf %103 : vector<32x256xf32> to vector<32x256xbf16>
    %c96 = arith.constant 96 : index
    %c0_26 = arith.constant 0 : index
    %105 = vector.load %arg7[%c96, %c0_26] : memref<128x256xbf16, #tpu.memory_space<vmem>>, vector<32x256xbf16>
    tpu.vector_store %arg7[%c96, %c0_26], %104 {strides = array<i32>} : memref<128x256xbf16, #tpu.memory_space<vmem>>, vector<32x256xbf16>,
    %c0_27 = arith.constant 0 : index
    %c0_28 = arith.constant 0 : index
    %106 = vector.load %arg8[%c0_27, %c0_28] : memref<16x128xf32, #tpu.memory_space<vmem>>, vector<16x128xf32>
    %c0_29 = arith.constant 0 : index
    %c0_30 = arith.constant 0 : index
    %107 = vector.load %arg5[%c0_29, %c0_30] : memref<16x256xbf16, #tpu.memory_space<vmem>>, vector<16x256xbf16>
    %c0_31 = arith.constant 0 : index
    %c0_32 = arith.constant 0 : index
    %108 = vector.load %arg7[%c0_31, %c0_32] : memref<128x256xbf16, #tpu.memory_space<vmem>>, vector<128x256xbf16>
    %cst_33 = arith.constant dense<0.000000e+00> : vector<16x128xf32>
    %109 = tpu.matmul %107, %108, %cst_33 {dimension_numbers = #tpu.dot_dimension_numbers<[1], [1], [0], [0], [0, 0, 1, 0], [], []>} : vector<16x256xbf16>, vector<128x256xbf16>, vector<16x128xf32> -> vector<16x128xf32>
    %110 = arith.addf %106, %109 : vector<16x128xf32>
    %c0_34 = arith.constant 0 : index
    %c0_35 = arith.constant 0 : index
    %111 = vector.load %arg8[%c0_34, %c0_35] : memref<16x128xf32, #tpu.memory_space<vmem>>, vector<16x128xf32>
    tpu.vector_store %arg8[%c0_34, %c0_35], %110 {strides = array<i32>} : memref<16x128xf32, #tpu.memory_space<vmem>>, vector<16x128xf32>,
    %c0_i32_36 = arith.constant 0 : i32
    %112 = arith.cmpi eq, %arg1, %c0_i32_36 : i32
    %113 = arith.extui %112 : i1 to i32
    %c0_i32_37 = arith.constant 0 : i32
    %114 = arith.cmpi ne, %113, %c0_i32_37 : i32
    scf.if %114 {
      %c0_38 = arith.constant 0 : index
      %c0_39 = arith.constant 0 : index
      %115 = vector.load %arg8[%c0_38, %c0_39] : memref<16x128xf32, #tpu.memory_space<vmem>>, vector<16x128xf32>
      %c0_40 = arith.constant 0 : index
      %c0_41 = arith.constant 0 : index
      %c0_42 = arith.constant 0 : index
      %116 = vector.load %arg6[%c0_40, %c0_41, %c0_42] : memref<1x16x128xf32, #tpu.memory_space<vmem>>, vector<1x16x128xf32>
      %117 = vector.shape_cast %116 : vector<1x16x128xf32> to vector<16x128xf32>
      %118 = vector.shape_cast %115 : vector<16x128xf32> to vector<1x16x128xf32>
      tpu.vector_store %arg6[%c0_40, %c0_41, %c0_42], %118 {strides = array<i32>} : memref<1x16x128xf32, #tpu.memory_space<vmem>>, vector<1x16x128xf32>,
    } else {
    }
    return
  }
  func.func @transform_0(%arg0: i32, %arg1: i32) -> (i32, i32, i32) {
    %c0_i32 = arith.constant 0 : i32
    %c0_i32_0 = arith.constant 0 : i32
    return %arg0, %c0_i32, %arg1 : i32, i32, i32
  }
  func.func @transform_1(%arg0: i32, %arg1: i32) -> (i32, i32) {
    %c0_i32 = arith.constant 0 : i32
    %c0_i32_0 = arith.constant 0 : i32
    %c0_i32_1 = arith.constant 0 : i32
    return %c0_i32, %c0_i32_0 : i32, i32
  }
  func.func @transform_2(%arg0: i32, %arg1: i32) -> (i32, i32) {
    %c0_i32 = arith.constant 0 : i32
    %c0_i32_0 = arith.constant 0 : i32
    %c0_i32_1 = arith.constant 0 : i32
    return %c0_i32, %c0_i32_0 : i32, i32
  }
  func.func @transform_3(%arg0: i32, %arg1: i32) -> (i32, i32) {
    %c0_i32 = arith.constant 0 : i32
    %c0_i32_0 = arith.constant 0 : i32
    return %c0_i32, %arg1 : i32, i32
  }
  func.func @transform_4(%arg0: i32, %arg1: i32) -> (i32, i32, i32) {
    %c0_i32 = arith.constant 0 : i32
    %c0_i32_0 = arith.constant 0 : i32
    %c0_i32_1 = arith.constant 0 : i32
    return %arg0, %c0_i32, %c0_i32_0 : i32, i32, i32
  }
}

</mosaic_0001>

<bundles_post_ra>
// kernel: tpu_custom_call.1
= control target key start
LH: loop header
LB: loop body
LE: loop exit
PB: predicated region body
PF: predicated region fallthrough
CT: control target
= control target key end

     0   :  { %v855_v2 = vmov 0   ;;  %s1358_s0 = inlined_call_operand.vmem [shape: f32[4,4,256], index: 0, kind: input, shape index: {}]   ;;  %s1359_s1 = inlined_call_operand.vmem [shape: f32[32,4], index: 1, kind: input, shape index: {}]   ;;  %s1360_s2 = inlined_call_operand.vmem [shape: f32[32,1], index: 2, kind: input, shape index: {}]   ;;  %s1361_s3 = inlined_call_operand.vmem [shape: bf16[16,256], index: 3, kind: input, shape index: {}]   ;;  %s1362_s4 = inlined_call_operand.hbm [shape: f32[1,16,128], index: 4, kind: output, shape index: {}]  }
   0x1   :  { %v50_v0 = vld [vmem:[%s1359_s1 + $0x10] sm:$0xff]  ;;  %815 = vset.pattern.permute.xlu1 %v855_v2  ;;  %814 = vset.pattern.permute.xlu0 %v855_v2 }
   0x2   :  { %v26_v1 = vld [vmem:[%s1360_s2 + $0x10] sm:$0xff] }
   0x3   :  { %9 = vsyncpa [#allocation5], 0  ;;  %64 = vperm.xlu0 %814, %v50_v0   ;;  %40 = vperm.xlu1 %815, %v26_v1   ;;  %v856_v3 = vmov 1   ;;  %v51_v4 = vld [vmem:[%s1359_s1 + $0x18] sm:$0xff]  ;;  %v49_v6 = vld [vmem:[%s1359_s1 + $0x8] sm:$0xff]  ;;  %v857_v7 = vmov 2  }
   0x4   :  { %816 = vset.pattern.permute.xlu2 %v856_v3  ;;  %v27_v5 = vld [vmem:[%s1360_s2 + $0x18] sm:$0xff]  ;;  %v858_v8 = vmov 3   ;;  %v48_v9 = vld [vmem:[%s1359_s1] sm:$0xff]  ;;  %v25_v11 = vld [vmem:[%s1360_s2 + $0x8] sm:$0xff]  ;;  %s859_s18 = smov [#allocation4]   ;;  %s702_s22 = sshll.u32 %s1362_s4, 4  ;;  %s703_s22 = int_to_ptr.hbm [resolvable:$true] %s702_s22 }
   0x5   :  { %81 = vperm.xlu2 %816, %v50_v0   ;;  %v24_v10 = vld [vmem:[%s1360_s2] sm:$0xff]  ;;  %v919_v13 = vld [vmem:[%s1358_s0 + $0x8] sm:$0xff]  ;;  %v930_v19 = vld [vmem:[%s1358_s0 + $0x10] sm:$0xff]  ;;  %s700_s19 = sshll.u32 %s859_s18, 4  ;;  %s861_s23 = smov 8   ;;  %s701_s19 = int_to_ptr.vmem [resolvable:$true] %s700_s19 }
   0x6   :  { %v914_v12 = vld [vmem:[%s1358_s0] sm:$0xff]  ;;  %v251_v17 = vperm.slane %v919_v13, 1  ;;  %v252_v18 = vperm.slane %v919_v13, 5  ;;  %v935_v20 = vld [vmem:[%s1358_s0 + $0x18] sm:$0xff]  ;;  %v358_v21 = vperm.slane %v930_v19, 1  ;;  %v359_v22 = vperm.slane %v930_v19, 5 }
   0x7   :  { %v144_v15 = vperm.slane %v914_v12, 1  ;;  %v145_v16 = vperm.slane %v914_v12, 5  ;;  %v465_v23 = vperm.slane %v935_v20, 1  ;;  %v466_v24 = vperm.slane %v935_v20, 5 }
   0x8   :  { %v945_v27 = vperm.slane %v251_v17, 1  ;;  %v947_v28 = vperm.slane %v252_v18, 1  ;;  %v949_v29 = vperm.slane %v358_v21, 1  ;;  %v951_v30 = vperm.slane %v359_v22, 1 }
   0x9   :  { %v941_v25 = vperm.slane %v144_v15, 1  ;;  %v943_v26 = vperm.slane %v145_v16, 1  ;;  %v953_v31 = vperm.slane %v465_v23, 1  ;;  %v955_v32 = vperm.slane %v466_v24, 1 }
   0xa   :  { %1394 = vst [vmem:[#allocation8_spill] sm:$0xff] %v945_v27  ;;  %v122_v33 = vperm.slane %v914_v12, 0  ;;  %v123_v34 = vperm.slane %v914_v12, 4  ;;  %v229_v35 = vperm.slane %v919_v13, 0  ;;  %v230_v36 = vperm.slane %v919_v13, 4 }
   0xb   :  { %69 = vperm.xlu0 %814, %v51_v4   ;;  %45 = vperm.xlu1 %815, %v27_v5   ;;  %1393 = vst [vmem:[#allocation7_spill] sm:$0xff] %v943_v26  ;;  %v336_v38 = vperm.slane %v930_v19, 0  ;;  %v337_v39 = vperm.slane %v930_v19, 4  ;;  %v443_v40 = vperm.slane %v935_v20, 0  ;;  %v444_v41 = vperm.slane %v935_v20, 4 }
   0xc   :  { %1395 = vst [vmem:[#allocation9_spill] sm:$0xff] %v947_v28  ;;  %v188_v42 = vperm.slane %v914_v12, 3  ;;  %v189_v43 = vperm.slane %v914_v12, 7  ;;  %v295_v44 = vperm.slane %v919_v13, 3  ;;  %v296_v45 = vperm.slane %v919_v13, 7 }
   0xd   :  { %85 = vperm.xlu2 %816, %v51_v4   ;;  %1396 = vst [vmem:[#allocation10_spill] sm:$0xff] %v949_v29  ;;  %v402_v46 = vperm.slane %v930_v19, 3  ;;  %v403_v47 = vperm.slane %v930_v19, 7  ;;  %v509_v48 = vperm.slane %v935_v20, 3  ;;  %v510_v49 = vperm.slane %v935_v20, 7 }
   0xe   :  { %1397 = vst [vmem:[#allocation11_spill] sm:$0xff] %v951_v30  ;;  %v973_v50 = vperm.slane %v122_v33, 0  ;;  %v975_v51 = vperm.slane %v123_v34, 0  ;;  %v977_v52 = vperm.slane %v229_v35, 0  ;;  %v979_v53 = vperm.slane %v230_v36, 0 }
   0xf   :  { %1398 = vst [vmem:[#allocation12_spill] sm:$0xff] %v953_v31  ;;  %v981_v54 = vperm.slane %v336_v38, 0  ;;  %v983_v55 = vperm.slane %v337_v39, 0  ;;  %v985_v56 = vperm.slane %v443_v40, 0  ;;  %v987_v57 = vperm.slane %v444_v41, 0 }
  0x10   :  { %1399 = vst [vmem:[#allocation13_spill] sm:$0xff] %v955_v32  ;;  %v989_v58 = vperm.slane %v188_v42, 3  ;;  %v991_v59 = vperm.slane %v189_v43, 3  ;;  %v993_v60 = vperm.slane %v295_v44, 3  ;;  %v995_v61 = vperm.slane %v296_v45, 3 }
  0x11   :  { %v997_v62 = vperm.slane %v402_v46, 3  ;;  %v999_v63 = vperm.slane %v403_v47, 3  ;;  %v1003_v1 = vperm.slane %v510_v49, 3  ;;  %v274_v5 = vperm.slane %v919_v13, 6 }
  0x12   :  { %1400 = vst [vmem:[#allocation14_spill] sm:$0xff] %v989_v58 }
  0x13   :  { %59 = vperm.xlu0 %814, %v49_v6   ;;  %817 = vset.pattern.permute.xlu1 %v857_v7  ;;  %1401 = vst [vmem:[#allocation15_spill] sm:$0xff] %v991_v59  ;;  %v1035_v23 = vperm.slane %v274_v5, 2 }
  0x14   :  { %101 = vperm.xlu1 %817, %v51_v4   ;;  %1402 = vst [vmem:[#allocation16_spill] sm:$0xff] %v993_v60 }
  0x15   :  { %818 = vset.pattern.permute.xlu2 %v858_v8  ;;  %1403 = vst [vmem:[#allocation17_spill] sm:$0xff] %v995_v61 }
  0x16   :  { %113 = vperm.xlu2 %818, %v50_v0   ;;  %1404 = vst [vmem:[#allocation18_spill] sm:$0xff] %v997_v62 }
  0x17   :  { %1405 = vst [vmem:[#allocation19_spill] sm:$0xff] %v999_v63 }
  0x18   :  { %1407 = vst [vmem:[#allocation21_spill] sm:$0xff] %v1003_v1 }
  0x1b   :  { %821 = vset.pattern.permute.xlu0 %v857_v7 }
  0x1c   :  { %97 = vperm.xlu0 %821, %v50_v0   ;;  %819 = vset.pattern.permute.xlu1 %v858_v8  ;;  %v1001_v0 = vperm.slane %v509_v48, 3 }
  0x1d   :  { %117 = vperm.xlu1 %819, %v51_v4   ;;  %v273_v4 = vperm.slane %v919_v13, 2 }
  0x1e   :  { %820 = vset.pattern.permute.xlu2 %v855_v2  ;;  %1406 = vst [vmem:[#allocation20_spill] sm:$0xff] %v1001_v0 }
  0x1f   :  { %54 = vperm.xlu2 %820, %v48_v9   ;;  %v1033_v22 = vperm.slane %v273_v4, 2 }
  0x24   :  { %89 = vperm.xlu0 %821, %v48_v9  }
  0x25   :  { %822 = vset.pattern.permute.xlu1 %v855_v2  ;;  %v166_v2 = vperm.slane %v914_v12, 2 }
  0x26   :  { %30 = vperm.xlu1 %822, %v24_v10  }
  0x27   :  { %35 = vperm.xlu2 %820, %v25_v11  }
  0x2c   :  { %828 = vset.pattern.permute.xlu0 %v858_v8 }
  0x2e   :  { %823 = vset.pattern.permute.xlu1 %v856_v3 }
  0x2f   :  { %73 = vperm.xlu1 %823, %v48_v9   ;;  %824 = vset.pattern.permute.xlu2 %v856_v3  ;;  %v167_v3 = vperm.slane %v914_v12, 6 }
  0x30   :  { %77 = vperm.xlu2 %824, %v49_v6  }
  0x31   :  { %v1031_v21 = vperm.slane %v167_v3, 2 }
  0x37   :  { %825 = vset.pattern.permute.xlu1 %v857_v7  ;;  %v381_v7 = vperm.slane %v930_v19, 6 }
  0x38   :  { %93 = vperm.xlu1 %825, %v49_v6   ;;  %826 = vset.pattern.permute.xlu2 %v858_v8 }
  0x39   :  { %105 = vperm.xlu2 %826, %v48_v9   ;;  %v488_v9 = vperm.slane %v935_v20, 6  ;;  %v1039_v33 = vperm.slane %v381_v7, 2 }
  0x3b   :  { %v1043_v35 = vperm.slane %v488_v9, 2 }
  0x40   :  { %827 = vset.pattern.permute.xlu1 %v858_v8  ;;  %v487_v8 = vperm.slane %v935_v20, 2  ;;  %v1029_v20 = vperm.slane %v166_v2, 2 }
  0x41   :  { %109 = vperm.xlu1 %827, %v49_v6   ;;  %v380_v6 = vperm.slane %v930_v19, 2 }
  0x42   :  { %v1041_v34 = vperm.slane %v487_v8, 2 }
  0x43   :  { %v1037_v24 = vperm.slane %v380_v6, 2 }
  0x5f   :  { %v921_v14 = vpop.permute.xlu2 %81 }
  0x60   :  { %v154_v10 = vmul.f32 %v941_v25, %v921_v14  ;;  %v155_v11 = vmul.f32 %v943_v26, %v921_v14  ;;  %v261_v12 = vmul.f32 %v945_v27, %v921_v14  ;;  %v262_v13 = vmul.f32 %v947_v28, %v921_v14 }
  0x61   :  { %v368_v16 = vmul.f32 %v949_v29, %v921_v14  ;;  %v369_v17 = vmul.f32 %v951_v30, %v921_v14  ;;  %v475_v18 = vmul.f32 %v953_v31, %v921_v14  ;;  %v476_v19 = vmul.f32 %v955_v32, %v921_v14 }
  0x67   :  { %v86_v37 = vpop.permute.xlu2 %85 }
  0x68   :  { %v1046_v36 = vmul.f32 %v941_v25, %v86_v37  ;;  %v1049_v14 = vmul.f32 %v943_v26, %v86_v37  ;;  %v1052_v38 = vmul.f32 %v945_v27, %v86_v37  ;;  %v1055_v39 = vmul.f32 %v947_v28, %v86_v37 }
  0x69   :  { %v1058_v40 = vmul.f32 %v949_v29, %v86_v37  ;;  %v1061_v41 = vmul.f32 %v951_v30, %v86_v37  ;;  %v1064_v42 = vmul.f32 %v953_v31, %v86_v37  ;;  %v1067_v43 = vmul.f32 %v955_v32, %v86_v37 }
  0x70   :  { %v114_v15 = vpop.permute.xlu2 %113 }
  0x71   :  { %v1078_v28 = vmul.f32 %v989_v58, %v114_v15  ;;  %v1081_v27 = vmul.f32 %v991_v59, %v114_v15  ;;  %v1084_v26 = vmul.f32 %v993_v60, %v114_v15 }
  0x75   :  { %v65_v44 = vpop.permute.xlu0 %64  ;;  %v41_v45 = vpop.permute.xlu1 %40 }
  0x76   :  { %v132_v46 = vmul.f32 %v973_v50, %v65_v44  ;;  %v133_v47 = vmul.f32 %v975_v51, %v65_v44  ;;  %v239_v48 = vmul.f32 %v977_v52, %v65_v44  ;;  %v240_v49 = vmul.f32 %v979_v53, %v65_v44 }
  0x77   :  { %v346_v2 = vmul.f32 %v981_v54, %v65_v44  ;;  %v347_v3 = vmul.f32 %v983_v55, %v65_v44  ;;  %v453_v4 = vmul.f32 %v985_v56, %v65_v44  ;;  %v454_v5 = vmul.f32 %v987_v57, %v65_v44 }
  0x78   :  { %v140_v37 = vadd.f32 %v132_v46, %v41_v45  ;;  %v141_v6 = vadd.f32 %v133_v47, %v41_v45  ;;  %v247_v7 = vadd.f32 %v239_v48, %v41_v45  ;;  %v248_v8 = vadd.f32 %v240_v49, %v41_v45 }
  0x79   :  { %v354_v9 = vadd.f32 %v346_v2, %v41_v45  ;;  %v355_v32 = vadd.f32 %v347_v3, %v41_v45  ;;  %v461_v31 = vadd.f32 %v453_v4, %v41_v45  ;;  %v462_v30 = vadd.f32 %v454_v5, %v41_v45  ;;  %v55_v29 = vpop.permute.xlu2 %54 }
  0x7a   :  { %v1087_v44 = vmul.f32 %v995_v61, %v114_v15  ;;  %v1090_v46 = vmul.f32 %v997_v62, %v114_v15  ;;  %v1093_v47 = vmul.f32 %v999_v63, %v114_v15  ;;  %v1096_v45 = vmul.f32 %v1001_v0, %v114_v15 }
  0x7b   :  { %v1099_v48 = vmul.f32 %v1003_v1, %v114_v15  ;;  %v1101_v49 = vadd.f32 %v154_v10, %v140_v37  ;;  %v1103_v2 = vadd.f32 %v155_v11, %v141_v6  ;;  %v1105_v3 = vadd.f32 %v261_v12, %v247_v7 }
  0x7c   :  { %v1107_v4 = vadd.f32 %v262_v13, %v248_v8  ;;  %v1109_v5 = vadd.f32 %v368_v16, %v354_v9  ;;  %v1111_v62 = vadd.f32 %v369_v17, %v355_v32  ;;  %v1113_v63 = vadd.f32 %v475_v18, %v461_v31 }
  0x7d   :  { %v1115_v61 = vadd.f32 %v476_v19, %v462_v30  ;;  %v70_v0 = vpop.permute.xlu0 %69  ;;  %v46_v60 = vpop.permute.xlu1 %45  ;;  %v1126_v1 = vmul.f32 %v973_v50, %v55_v29  ;;  %v1129_v59 = vmul.f32 %v975_v51, %v55_v29  ;;  %v1132_v58 = vmul.f32 %v977_v52, %v55_v29 }
  0x7e   :  { %v134_v15 = vmul.f32 %v973_v50, %v70_v0  ;;  %v135_v10 = vmul.f32 %v975_v51, %v70_v0  ;;  %v241_v11 = vmul.f32 %v977_v52, %v70_v0  ;;  %v242_v12 = vmul.f32 %v979_v53, %v70_v0 }
  0x7f   :  { %v348_v13 = vmul.f32 %v981_v54, %v70_v0  ;;  %v349_v16 = vmul.f32 %v983_v55, %v70_v0  ;;  %v455_v32 = vmul.f32 %v985_v56, %v70_v0  ;;  %v456_v31 = vmul.f32 %v987_v57, %v70_v0 }
  0x80   :  { %v142_v30 = vadd.f32 %v134_v15, %v46_v60  ;;  %v143_v17 = vadd.f32 %v135_v10, %v46_v60  ;;  %v249_v18 = vadd.f32 %v241_v11, %v46_v60  ;;  %v250_v19 = vadd.f32 %v242_v12, %v46_v60 }
  0x81   :  { %v356_v37 = vadd.f32 %v348_v13, %v46_v60  ;;  %v357_v6 = vadd.f32 %v349_v16, %v46_v60  ;;  %v463_v7 = vadd.f32 %v455_v32, %v46_v60  ;;  %v464_v8 = vadd.f32 %v456_v31, %v46_v60  ;;  %v36_v9 = vpop.permute.xlu2 %35 }
  0x82   :  { %v1135_v0 = vmul.f32 %v979_v53, %v55_v29  ;;  %v1138_v15 = vmul.f32 %v981_v54, %v55_v29  ;;  %v1141_v10 = vmul.f32 %v983_v55, %v55_v29  ;;  %v1144_v60 = vmul.f32 %v985_v56, %v55_v29 }
  0x83   :  { %v1147_v11 = vmul.f32 %v987_v57, %v55_v29  ;;  %v164_v12 = vadd.f32 %v1046_v36, %v142_v30  ;;  %v165_v13 = vadd.f32 %v1049_v14, %v143_v17  ;;  %v271_v16 = vadd.f32 %v1052_v38, %v249_v18 }
  0x84   :  { %1408 = vst [vmem:[#allocation22_spill] sm:$0xff] %v1135_v0  ;;  %v272_v32 = vadd.f32 %v1055_v39, %v250_v19  ;;  %v378_v31 = vadd.f32 %v1058_v40, %v356_v37  ;;  %v486_v0 = vadd.f32 %v1067_v43, %v464_v8 }
  0x85   :  { %1409 = vst [vmem:[#allocation23_spill] sm:$0xff] %v1138_v15  ;;  %v379_v15 = vadd.f32 %v1061_v41, %v357_v6 }
  0x86   :  { %1410 = vst [vmem:[#allocation24_spill] sm:$0xff] %v1141_v10  ;;  %v485_v10 = vadd.f32 %v1064_v42, %v463_v7  ;;  %v102_v38 = vpop.permute.xlu1 %101 }
  0x87   :  { %1411 = vst [vmem:[#allocation25_spill] sm:$0xff] %v1144_v60  ;;  %v60_v60 = vpop.permute.xlu0 %59  ;;  %v178_v43 = vmul.f32 %v1029_v20, %v102_v38  ;;  %v179_v30 = vmul.f32 %v1031_v21, %v102_v38 }
  0x88   :  { %1412 = vst [vmem:[#allocation26_spill] sm:$0xff] %v1147_v11  ;;  %v130_v29 = vmul.f32 %v973_v50, %v60_v60  ;;  %v131_v11 = vmul.f32 %v975_v51, %v60_v60  ;;  %v237_v36 = vmul.f32 %v977_v52, %v60_v60  ;;  %v238_v14 = vmul.f32 %v979_v53, %v60_v60 }
  0x89   :  { %v344_v39 = vmul.f32 %v981_v54, %v60_v60  ;;  %v345_v40 = vmul.f32 %v983_v55, %v60_v60  ;;  %v451_v41 = vmul.f32 %v985_v56, %v60_v60  ;;  %v452_v42 = vmul.f32 %v987_v57, %v60_v60 }
  0x8a   :  { %v285_v50 = vmul.f32 %v1033_v22, %v102_v38  ;;  %v286_v51 = vmul.f32 %v1035_v23, %v102_v38  ;;  %v392_v52 = vmul.f32 %v1037_v24, %v102_v38  ;;  %v393_v53 = vmul.f32 %v1039_v33, %v102_v38  ;;  %v1189_v8 = vpop.permute.xlu2 %77 }
  0x8b   :  { %v499_v54 = vmul.f32 %v1041_v34, %v102_v38  ;;  %v500_v55 = vmul.f32 %v1043_v35, %v102_v38  ;;  %v1173_v17 = vadd.f32 %v178_v43, %v164_v12  ;;  %v1175_v56 = vadd.f32 %v179_v30, %v165_v13 }
  0x8c   :  { %v1177_v57 = vadd.f32 %v285_v50, %v271_v16  ;;  %v1179_v18 = vadd.f32 %v286_v51, %v272_v32  ;;  %v1181_v19 = vadd.f32 %v392_v52, %v378_v31  ;;  %v1183_v37 = vadd.f32 %v393_v53, %v379_v15 }
  0x8d   :  { %v1185_v6 = vadd.f32 %v499_v54, %v485_v10  ;;  %v1187_v7 = vadd.f32 %v500_v55, %v486_v0  ;;  %v1191_v60 = vadd.f32 %v130_v29, %v36_v9  ;;  %v1193_v12 = vadd.f32 %v131_v11, %v36_v9  ;;  %v1418_v11 = vld [vmem:[#allocation7_spill] sm:$0xff] }
  0x8e   :  { %v1195_v13 = vadd.f32 %v237_v36, %v36_v9  ;;  %v1197_v16 = vadd.f32 %v238_v14, %v36_v9  ;;  %v1199_v32 = vadd.f32 %v344_v39, %v36_v9  ;;  %v1201_v31 = vadd.f32 %v345_v40, %v36_v9  ;;  %v1419_v36 = vld [vmem:[#allocation8_spill] sm:$0xff]  ;;  %v1421_v39 = vld [vmem:[#allocation9_spill] sm:$0xff] }
  0x8f   :  { %v1203_v15 = vadd.f32 %v451_v41, %v36_v9  ;;  %v1205_v10 = vadd.f32 %v452_v42, %v36_v9  ;;  %v98_v0 = vpop.permute.xlu0 %97  ;;  %v1209_v38 = vmul.f32 %v941_v25, %v1189_v8  ;;  %v1213_v29 = vmul.f32 %v1418_v11, %v1189_v8  ;;  %v118_v30 = vpop.permute.xlu1 %117 }
  0x90   :  { %1413 = vst [vmem:[#allocation27_spill] sm:$0xff] %v1197_v16  ;;  %v1217_v14 = vmul.f32 %v1419_v36, %v1189_v8  ;;  %v1221_v40 = vmul.f32 %v1421_v39, %v1189_v8  ;;  %v176_v9 = vmul.f32 %v1029_v20, %v98_v0  ;;  %v177_v41 = vmul.f32 %v1031_v21, %v98_v0 }
  0x91   :  { %1414 = vst [vmem:[#allocation28_spill] sm:$0xff] %v1199_v32  ;;  %v283_v42 = vmul.f32 %v1033_v22, %v98_v0  ;;  %v284_v43 = vmul.f32 %v1035_v23, %v98_v0  ;;  %v390_v50 = vmul.f32 %v1037_v24, %v98_v0  ;;  %v391_v51 = vmul.f32 %v1039_v33, %v98_v0 }
  0x92   :  { %1415 = vst [vmem:[#allocation29_spill] sm:$0xff] %v1201_v31  ;;  %v497_v52 = vmul.f32 %v1041_v34, %v98_v0  ;;  %v498_v53 = vmul.f32 %v1043_v35, %v98_v0  ;;  %v184_v54 = vadd.f32 %v176_v9, %v1101_v49  ;;  %v185_v55 = vadd.f32 %v177_v41, %v1103_v2 }
  0x93   :  { %1416 = vst [vmem:[#allocation30_spill] sm:$0xff] %v1203_v15  ;;  %v292_v15 = vadd.f32 %v284_v43, %v1107_v4  ;;  %v398_v31 = vadd.f32 %v390_v50, %v1109_v5  ;;  %v399_v32 = vadd.f32 %v391_v51, %v1111_v62 }
  0x94   :  { %1417 = vst [vmem:[#allocation31_spill] sm:$0xff] %v1205_v10  ;;  %v291_v10 = vadd.f32 %v283_v42, %v1105_v3  ;;  %v506_v16 = vadd.f32 %v498_v53, %v1115_v61  ;;  %v207_v0 = vadd.f32 %v1081_v27, %v185_v55 }
  0x95   :  { %1420 = vst [vmem:[#allocation7_spill] sm:$0xff] %v1217_v14  ;;  %v206_v14 = vadd.f32 %v1078_v28, %v184_v54  ;;  %v314_v2 = vadd.f32 %v1087_v44, %v292_v15  ;;  %v420_v3 = vadd.f32 %v1090_v46, %v398_v31  ;;  %v421_v4 = vadd.f32 %v1093_v47, %v399_v32  ;;  %v1424_v15 = vld [vmem:[#allocation15_spill] sm:$0xff]  ;;  %v1425_v32 = vld [vmem:[#allocation16_spill] sm:$0xff] }
  0x96   :  { %1422 = vst [vmem:[#allocation8_spill] sm:$0xff] %v1221_v40  ;;  %v505_v40 = vadd.f32 %v497_v52, %v1113_v63  ;;  %v313_v49 = vadd.f32 %v1084_v26, %v291_v10  ;;  %v528_v62 = vadd.f32 %v1099_v48, %v506_v16  ;;  %v215_v63 = vmax.f32 %v207_v0, 0.0  ;;  %v1423_v10 = vld [vmem:[#allocation14_spill] sm:$0xff]  ;;  %v1428_v54 = vld [vmem:[#allocation19_spill] sm:$0xff] }
  0x97   :  { %v214_v9 = vmax.f32 %v206_v14, 0.0  ;;  %v322_v61 = vmax.f32 %v314_v2, 0.0  ;;  %v428_v42 = vmax.f32 %v420_v3, 0.0  ;;  %v429_v28 = vmax.f32 %v421_v4, 0.0  ;;  %v1427_v52 = vld [vmem:[#allocation18_spill] sm:$0xff]  ;;  %v1429_v2 = vld [vmem:[#allocation20_spill] sm:$0xff] }
  0x98   :  { %v527_v5 = vadd.f32 %v1096_v45, %v505_v40  ;;  %v321_v41 = vmax.f32 %v313_v49, 0.0  ;;  %v536_v27 = vmax.f32 %v528_v62, 0.0  ;;  %v200_v44 = vmul.f32 %v1423_v10, %v118_v30  ;;  %v1426_v40 = vld [vmem:[#allocation17_spill] sm:$0xff]  ;;  %v31_v16 = vpop.permute.xlu1 %30 }
  0x99   :  { %v220_v50 = vpack.c.bf16 %v215_v63, %v214_v9  ;;  %v201_v46 = vmul.f32 %v1424_v15, %v118_v30  ;;  %v434_v31 = vpack.c.bf16 %v429_v28, %v428_v42  ;;  %v307_v45 = vmul.f32 %v1425_v32, %v118_v30  ;;  %v1430_v4 = vld [vmem:[#allocation21_spill] sm:$0xff] }
  0x9a   :  { %v535_v43 = vmax.f32 %v527_v5, 0.0  ;;  %v327_v26 = vpack.c.bf16 %v322_v61, %v321_v41  ;;  %v308_v48 = vmul.f32 %v1426_v40, %v118_v30  ;;  %v208_v14 = vadd.f32 %v200_v44, %v1173_v17 }
  0x9b   :  { %224 = vst [vmem:[#allocation2 + $0x10] sm:$0xff] %v220_v50  ;;  %v209_v51 = vadd.f32 %v201_v46, %v1175_v56  ;;  %v414_v53 = vmul.f32 %v1427_v52, %v118_v30  ;;  %v415_v55 = vmul.f32 %v1428_v54, %v118_v30  ;;  %v315_v0 = vadd.f32 %v307_v45, %v1177_v57 }
  0x9c   :  { %v541_v47 = vpack.c.bf16 %v536_v27, %v535_v43  ;;  %331 = vst [vmem:[#allocation2 + $0x30] sm:$0xff] %v327_v26  ;;  %v316_v49 = vadd.f32 %v308_v48, %v1179_v18  ;;  %v521_v3 = vmul.f32 %v1429_v2, %v118_v30  ;;  %v522_v5 = vmul.f32 %v1430_v4, %v118_v30  ;;  %v1431_v43 = vld [vmem:[#allocation10_spill] sm:$0xff] }
  0x9d   :  { %438 = vst [vmem:[#allocation2 + $0x50] sm:$0xff] %v434_v31  ;;  %v216_v62 = vmax.f32 %v208_v14, 0.0  ;;  %v217_v9 = vmax.f32 %v209_v51, 0.0  ;;  %v422_v17 = vadd.f32 %v414_v53, %v1181_v19  ;;  %v423_v56 = vadd.f32 %v415_v55, %v1183_v37  ;;  %v1432_v19 = vld [vmem:[#allocation11_spill] sm:$0xff]  ;;  %v1435_v51 = vld [vmem:[#allocation22_spill] sm:$0xff] }
  0x9e   :  { %545 = vst [vmem:[#allocation2 + $0x70] sm:$0xff] %v541_v47  ;;  %v323_v63 = vmax.f32 %v315_v0, 0.0  ;;  %v324_v41 = vmax.f32 %v316_v49, 0.0  ;;  %v529_v61 = vadd.f32 %v521_v3, %v1185_v6  ;;  %v530_v57 = vadd.f32 %v522_v5, %v1187_v7  ;;  %v1433_v6 = vld [vmem:[#allocation12_spill] sm:$0xff]  ;;  %v1434_v7 = vld [vmem:[#allocation13_spill] sm:$0xff]  ;;  %v1436_v55 = vld [vmem:[#allocation23_spill] sm:$0xff] }
  0x9f   :  { %v221_v42 = vpack.c.bf16 %v217_v9, %v216_v62  ;;  %v430_v18 = vmax.f32 %v422_v17, 0.0  ;;  %v431_v28 = vmax.f32 %v423_v56, 0.0  ;;  %v1265_v30 = vmul.f32 %v1431_v43, %v1189_v8  ;;  %v1437_v49 = vld [vmem:[#allocation24_spill] sm:$0xff]  ;;  %v1438_v5 = vld [vmem:[#allocation25_spill] sm:$0xff]  ;;  %v1439_v9 = vld [vmem:[#allocation26_spill] sm:$0xff]  ;;  %v90_v56 = vpop.permute.xlu0 %89 }
  0xa0   :  { %v328_v27 = vpack.c.bf16 %v324_v41, %v323_v63  ;;  %v537_v50 = vmax.f32 %v529_v61, 0.0  ;;  %v538_v26 = vmax.f32 %v530_v57, 0.0  ;;  %v1269_v37 = vmul.f32 %v1432_v19, %v1189_v8 }
  0xa1   :  { %225 = vst [vmem:[#allocation2 + $0x18] sm:$0xff] %v221_v42  ;;  %v435_v44 = vpack.c.bf16 %v431_v28, %v430_v18  ;;  %v1273_v46 = vmul.f32 %v1433_v6, %v1189_v8  ;;  %v1277_v31 = vmul.f32 %v1434_v7, %v1189_v8  ;;  %v136_v47 = vadd.f32 %v1126_v1, %v31_v16  ;;  %v74_v17 = vpop.permute.xlu1 %73 }
  0xa2   :  { %332 = vst [vmem:[#allocation2 + $0x38] sm:$0xff] %v328_v27  ;;  %v542_v45 = vpack.c.bf16 %v538_v26, %v537_v50  ;;  %v137_v48 = vadd.f32 %v1129_v59, %v31_v16  ;;  %v243_v14 = vadd.f32 %v1132_v58, %v31_v16  ;;  %v244_v53 = vadd.f32 %v1435_v51, %v31_v16 }
  0xa3   :  { %439 = vst [vmem:[#allocation2 + $0x58] sm:$0xff] %v435_v44  ;;  %v350_v0 = vadd.f32 %v1436_v55, %v31_v16  ;;  %v351_v3 = vadd.f32 %v1437_v49, %v31_v16  ;;  %v457_v62 = vadd.f32 %v1438_v5, %v31_v16  ;;  %v458_v8 = vadd.f32 %v1439_v9, %v31_v16  ;;  %v106_v44 = vpop.permute.xlu2 %105 }
  0xa4   :  { %546 = vst [vmem:[#allocation2 + $0x78] sm:$0xff] %v542_v45  ;;  %v150_v1 = vmul.f32 %v941_v25, %v74_v17  ;;  %v151_v59 = vmul.f32 %v1418_v11, %v74_v17  ;;  %v257_v58 = vmul.f32 %v1419_v36, %v74_v17  ;;  %v258_v63 = vmul.f32 %v1421_v39, %v74_v17 }
  0xa5   :  { %v364_v41 = vmul.f32 %v1431_v43, %v74_v17  ;;  %v365_v61 = vmul.f32 %v1432_v19, %v74_v17  ;;  %v471_v57 = vmul.f32 %v1433_v6, %v74_v17  ;;  %v472_v42 = vmul.f32 %v1434_v7, %v74_v17  ;;  %v805_v51 = vld [vmem:[#allocation2 + $0x74] sm:$0xf] }
  0xa6   :  { %v158_v16 = vadd.f32 %v150_v1, %v136_v47  ;;  %v159_v18 = vadd.f32 %v151_v59, %v137_v48  ;;  %v172_v28 = vmul.f32 %v1029_v20, %v90_v56  ;;  %v173_v25 = vmul.f32 %v1031_v21, %v90_v56  ;;  %v783_v48 = vld [vmem:[#allocation2 + $0x70] sm:$0xf] }
  0xa7   :  { %v265_v27 = vadd.f32 %v257_v58, %v243_v14  ;;  %v266_v11 = vadd.f32 %v258_v63, %v244_v53  ;;  %v279_v36 = vmul.f32 %v1033_v22, %v90_v56  ;;  %v280_v39 = vmul.f32 %v1035_v23, %v90_v56 }
  0xa8   :  { %v180_v50 = vadd.f32 %v172_v28, %v158_v16  ;;  %v181_v43 = vadd.f32 %v173_v25, %v159_v18  ;;  %v372_v26 = vadd.f32 %v364_v41, %v350_v0  ;;  %v373_v19 = vadd.f32 %v365_v61, %v351_v3 }
  0xa9   :  { %v287_v6 = vadd.f32 %v279_v36, %v265_v27  ;;  %v288_v45 = vadd.f32 %v280_v39, %v266_v11  ;;  %v386_v7 = vmul.f32 %v1037_v24, %v90_v56  ;;  %v387_v47 = vmul.f32 %v1039_v33, %v90_v56 }
  0xaa   :  { %v479_v55 = vadd.f32 %v471_v57, %v457_v62  ;;  %v480_v14 = vadd.f32 %v472_v42, %v458_v8  ;;  %v493_v53 = vmul.f32 %v1041_v34, %v90_v56  ;;  %v494_v49 = vmul.f32 %v1043_v35, %v90_v56  ;;  %v94_v61 = vpop.permute.xlu1 %93 }
  0xab   :  { %v394_v5 = vadd.f32 %v386_v7, %v372_v26  ;;  %v395_v9 = vadd.f32 %v387_v47, %v373_v19  ;;  %v806_v17 = vld [vmem:[#allocation2 + $0x74] sm:$0xf0]  ;;  %v785_v0 = vld [vmem:[#allocation2 + $0x78] sm:$0xf0]  ;;  %v194_v3 = vmul.f32 %v1423_v10, %v106_v44  ;;  %v195_v1 = vmul.f32 %v1424_v15, %v106_v44 }
  0xac   :  { %v501_v59 = vadd.f32 %v493_v53, %v479_v55  ;;  %v502_v58 = vadd.f32 %v494_v49, %v480_v14  ;;  %v784_v63 = vor.u32 %v806_v17, %v783_v48  ;;  %v788_v41 = vor.u32 %v805_v51, %v785_v0 }
  0xad   :  { %v202_v16 = vadd.f32 %v194_v3, %v180_v50  ;;  %v203_v62 = vadd.f32 %v195_v1, %v181_v43  ;;  %v301_v8 = vmul.f32 %v1425_v32, %v106_v44  ;;  %v302_v57 = vmul.f32 %v1426_v40, %v106_v44 }
  0xae   :  { %657 = vmatpush.bf16.xpose.msra.mxu0 %v784_v63  ;;  %671 = vmatpush.bf16.xpose.msra.mxu1 %v788_v41  ;;  %v408_v56 = vmul.f32 %v1427_v52, %v106_v44  ;;  %v409_v42 = vmul.f32 %v1428_v54, %v106_v44  ;;  %v515_v18 = vmul.f32 %v1429_v2, %v106_v44 }
  0xaf   :  { %v210_v28 = vmax.f32 %v202_v16, 0.0  ;;  %v211_v25 = vmax.f32 %v203_v62, 0.0  ;;  %v309_v27 = vadd.f32 %v301_v8, %v287_v6  ;;  %v310_v11 = vadd.f32 %v302_v57, %v288_v45 }
  0xb0   :  { %v416_v36 = vadd.f32 %v408_v56, %v394_v5  ;;  %v417_v39 = vadd.f32 %v409_v42, %v395_v9  ;;  %v516_v50 = vmul.f32 %v1430_v4, %v106_v44  ;;  %v523_v43 = vadd.f32 %v515_v18, %v501_v59  ;;  %v1441_v59 = vld [vmem:[#allocation27_spill] sm:$0xff] }
  0xb1   :  { %v218_v26 = vpack.c.bf16 %v211_v25, %v210_v28  ;;  %v317_v19 = vmax.f32 %v309_v27, 0.0  ;;  %v318_v7 = vmax.f32 %v310_v11, 0.0  ;;  %v174_v47 = vmul.f32 %v1029_v20, %v94_v61 }
  0xb2   :  { %v424_v48 = vmax.f32 %v416_v36, 0.0  ;;  %v425_v51 = vmax.f32 %v417_v39, 0.0  ;;  %v524_v55 = vadd.f32 %v516_v50, %v502_v58  ;;  %v531_v14 = vmax.f32 %v523_v43, 0.0 }
  0xb3   :  { %222 = vst [vmem:[#allocation2] sm:$0xff] %v218_v26  ;;  %v325_v53 = vpack.c.bf16 %v318_v7, %v317_v19  ;;  %v175_v49 = vmul.f32 %v1031_v21, %v94_v61  ;;  %v281_v6 = vmul.f32 %v1033_v22, %v94_v61  ;;  %v282_v45 = vmul.f32 %v1035_v23, %v94_v61  ;;  %v1440_v23 = vld [vmem:[#allocation7_spill] sm:$0xff] }
  0xb4   :  { %v432_v5 = vpack.c.bf16 %v425_v51, %v424_v48  ;;  %v532_v44 = vmax.f32 %v524_v55, 0.0  ;;  %v388_v9 = vmul.f32 %v1037_v24, %v94_v61  ;;  %v389_v17 = vmul.f32 %v1039_v33, %v94_v61  ;;  %v1442_v24 = vld [vmem:[#allocation8_spill] sm:$0xff] }
  0xb5   :  { %329 = vst [vmem:[#allocation2 + $0x20] sm:$0xff] %v325_v53  ;;  %v495_v20 = vmul.f32 %v1041_v34, %v94_v61  ;;  %v496_v0 = vmul.f32 %v1043_v35, %v94_v61  ;;  %v160_v3 = vadd.f32 %v1209_v38, %v1191_v60  ;;  %v161_v21 = vadd.f32 %v1213_v29, %v1193_v12  ;;  %v1443_v33 = vld [vmem:[#allocation28_spill] sm:$0xff]  ;;  %v110_v34 = vpop.permute.xlu1 %109  ;;  %v1444_v61 = vld [vmem:[#allocation29_spill] sm:$0xff]  ;;  %v1445_v38 = vld [vmem:[#allocation30_spill] sm:$0xff] }
  0xb6   :  { %436 = vst [vmem:[#allocation2 + $0x40] sm:$0xff] %v432_v5  ;;  %v539_v22 = vpack.c.bf16 %v532_v44, %v531_v14  ;;  %v267_v1 = vadd.f32 %v1440_v23, %v1195_v13  ;;  %v268_v58 = vadd.f32 %v1442_v24, %v1441_v59  ;;  %v374_v63 = vadd.f32 %v1265_v30, %v1443_v33  ;;  %v1446_v13 = vld [vmem:[#allocation31_spill] sm:$0xff]  ;;  %v798_v33 = vld [vmem:[#allocation2 + $0x34] sm:$0xf0] }
  0xb7   :  { %v182_v41 = vadd.f32 %v174_v47, %v160_v3  ;;  %v183_v35 = vadd.f32 %v175_v49, %v161_v21  ;;  %v375_v60 = vadd.f32 %v1269_v37, %v1444_v61  ;;  %v481_v12 = vadd.f32 %v1273_v46, %v1445_v38  ;;  %v767_v44 = vld [vmem:[#allocation2 + $0x50] sm:$0xf] }
  0xb8   :  { %543 = vst [vmem:[#allocation2 + $0x60] sm:$0xff] %v539_v22  ;;  %v289_v29 = vadd.f32 %v281_v6, %v267_v1  ;;  %v290_v16 = vadd.f32 %v282_v45, %v268_v58  ;;  %v396_v62 = vadd.f32 %v388_v9, %v374_v63  ;;  %v482_v8 = vadd.f32 %v1277_v31, %v1446_v13  ;;  %v802_v9 = vld [vmem:[#allocation2 + $0x54] sm:$0xf0]  ;;  %v751_v58 = vld [vmem:[#allocation2 + $0x30] sm:$0xf] }
  0xb9   :  { %v397_v57 = vadd.f32 %v389_v17, %v375_v60  ;;  %v503_v56 = vadd.f32 %v495_v20, %v481_v12  ;;  %v196_v30 = vmul.f32 %v1423_v10, %v110_v34  ;;  %v197_v42 = vmul.f32 %v1424_v15, %v110_v34  ;;  %v801_v17 = vld [vmem:[#allocation2 + $0x54] sm:$0xf]  ;;  %v769_v20 = vld [vmem:[#allocation2 + $0x58] sm:$0xf0]  ;;  %v794_v13 = vld [vmem:[#allocation2 + $0x14] sm:$0xf0] }
  0xba   :  { %v504_v18 = vadd.f32 %v496_v0, %v482_v8  ;;  %v303_v28 = vmul.f32 %v1425_v32, %v110_v34  ;;  %v304_v37 = vmul.f32 %v1426_v40, %v110_v34  ;;  %v410_v46 = vmul.f32 %v1427_v52, %v110_v34  ;;  %v797_v63 = vld [vmem:[#allocation2 + $0x34] sm:$0xf] }
  0xbb   :  { %v204_v25 = vadd.f32 %v196_v30, %v182_v41  ;;  %v205_v27 = vadd.f32 %v197_v42, %v183_v35  ;;  %v411_v11 = vmul.f32 %v1428_v54, %v110_v34  ;;  %v517_v36 = vmul.f32 %v1429_v2, %v110_v34  ;;  %v793_v8 = vld [vmem:[#allocation2 + $0x14] sm:$0xf] }
  0xbc   :  { %v311_v31 = vadd.f32 %v303_v28, %v289_v29  ;;  %v312_v39 = vadd.f32 %v304_v37, %v290_v16  ;;  %v418_v50 = vadd.f32 %v410_v46, %v396_v62  ;;  %v518_v10 = vmul.f32 %v1430_v4, %v110_v34  ;;  %v753_v34 = vld [vmem:[#allocation2 + $0x38] sm:$0xf0]  ;;  %v743_v38 = vld [vmem:[#allocation2 + $0x20] sm:$0xf]  ;;  %v795_v12 = vld [vmem:[#allocation2 + $0x24] sm:$0xf] }
  0xbd   :  { %v212_v43 = vmax.f32 %v204_v25, 0.0  ;;  %v213_v15 = vmax.f32 %v205_v27, 0.0  ;;  %v419_v26 = vadd.f32 %v411_v11, %v397_v57  ;;  %v525_v19 = vadd.f32 %v517_v36, %v503_v56  ;;  %v759_v23 = vld [vmem:[#allocation2 + $0x40] sm:$0xf]  ;;  %v799_v1 = vld [vmem:[#allocation2 + $0x44] sm:$0xf] }
  0xbe   :  { %v319_v32 = vmax.f32 %v311_v31, 0.0  ;;  %v320_v7 = vmax.f32 %v312_v39, 0.0  ;;  %v426_v40 = vmax.f32 %v418_v50, 0.0  ;;  %v526_v47 = vadd.f32 %v518_v10, %v504_v18  ;;  %v735_v62 = vld [vmem:[#allocation2 + $0x10] sm:$0xf] }
  0xbf   :  { %v219_v52 = vpack.c.bf16 %v213_v15, %v212_v43  ;;  %v427_v48 = vmax.f32 %v419_v26, 0.0  ;;  %v533_v51 = vmax.f32 %v525_v19, 0.0  ;;  %v775_v4 = vld [vmem:[#allocation2 + $0x60] sm:$0xf]  ;;  %v803_v49 = vld [vmem:[#allocation2 + $0x64] sm:$0xf]  ;;  %v768_v0 = vor.u32 %v802_v9, %v767_v44 }
  0xc0   :  { %v326_v55 = vpack.c.bf16 %v320_v7, %v319_v32  ;;  %v534_v54 = vmax.f32 %v526_v47, 0.0  ;;  %v772_v3 = vor.u32 %v801_v17, %v769_v20  ;;  %v752_v41 = vor.u32 %v798_v33, %v751_v58  ;;  %v737_v57 = vld [vmem:[#allocation2 + $0x18] sm:$0xf0]  ;;  %v727_v28 = vld [vmem:[#allocation2] sm:$0xf] }
  0xc1   :  { %223 = vst [vmem:[#allocation2 + $0x8] sm:$0xff] %v219_v52  ;;  %v433_v2 = vpack.c.bf16 %v427_v48, %v426_v40  ;;  %v756_v35 = vor.u32 %v797_v63, %v753_v34  ;;  %v736_v56 = vor.u32 %v794_v13, %v735_v62  ;;  %v740_v30 = vor.u32 %v793_v8, %v737_v57  ;;  %v791_v37 = vld [vmem:[#allocation2 + $0x4] sm:$0xf]  ;;  %v719_v27 = vld [vmem:[%s1361_s3] sm:$0xf] }
  0xc2   :  { %330 = vst [vmem:[#allocation2 + $0x28] sm:$0xff] %v326_v55  ;;  %v540_v14 = vpack.c.bf16 %v534_v54, %v533_v51  ;;  %v790_v11 = vld [vmem:[%s1361_s3 + $0x4] sm:$0xf0]  ;;  %v789_v36 = vld [vmem:[%s1361_s3 + $0x4] sm:$0xf] }
  0xc3   :  { %437 = vst [vmem:[#allocation2 + $0x48] sm:$0xff] %v433_v2  ;;  %v721_v31 = vld [vmem:[%s1361_s3 + $0x8] sm:$0xf0]  ;;  %v720_v39 = vor.u32 %v790_v11, %v719_v27  ;;  %s860_s3 = smov 128  }
  0xc4   :  { %544 = vst [vmem:[#allocation2 + $0x68] sm:$0xff] %v540_v14  ;;  %v724_v50 = vor.u32 %v789_v36, %v721_v31 }
  0xc8   :  { %v792_v42 = vld [vmem:[#allocation2 + $0x4] sm:$0xf0]  ;;  %v729_v18 = vld [vmem:[#allocation2 + $0x8] sm:$0xf0] }
  0xc9   :  { %v796_v61 = vld [vmem:[#allocation2 + $0x24] sm:$0xf0]  ;;  %v745_v60 = vld [vmem:[#allocation2 + $0x28] sm:$0xf0]  ;;  %v728_v46 = vor.u32 %v792_v42, %v727_v28  ;;  %v732_v25 = vor.u32 %v791_v37, %v729_v18 }
  0xca   :  { %v800_v21 = vld [vmem:[#allocation2 + $0x44] sm:$0xf0]  ;;  %v761_v22 = vld [vmem:[#allocation2 + $0x48] sm:$0xf0]  ;;  %v744_v29 = vor.u32 %v796_v61, %v743_v38  ;;  %v748_v16 = vor.u32 %v795_v12, %v745_v60 }
  0xcb   :  { %v804_v53 = vld [vmem:[#allocation2 + $0x64] sm:$0xf0]  ;;  %v777_v6 = vld [vmem:[#allocation2 + $0x68] sm:$0xf0]  ;;  %v760_v59 = vor.u32 %v800_v21, %v759_v23  ;;  %v764_v24 = vor.u32 %v799_v1, %v761_v22 }
  0xcc   :  { %v776_v45 = vor.u32 %v804_v53, %v775_v4  ;;  %v780_v5 = vor.u32 %v803_v49, %v777_v6 }
  0xce   :  { %658 = vmatpush.bf16.xpose.msra.mxu0 %v776_v45  ;;  %672 = vmatpush.bf16.xpose.msra.mxu1 %v780_v5 }
  0xd6   :  { %659 = vmatpush.bf16.xpose.msra.mxu0 %v768_v0  ;;  %673 = vmatpush.bf16.xpose.msra.mxu1 %v772_v3 }
  0xde   :  { %660 = vmatpush.bf16.xpose.msra.mxu0 %v760_v59  ;;  %674 = vmatpush.bf16.xpose.msra.mxu1 %v764_v24 }
  0xe6   :  { %661 = vmatpush.bf16.xpose.msra.mxu0 %v752_v41  ;;  %675 = vmatpush.bf16.xpose.msra.mxu1 %v756_v35 }
  0xee   :  { %662 = vmatpush.bf16.xpose.msra.mxu0 %v744_v29  ;;  %676 = vmatpush.bf16.xpose.msra.mxu1 %v748_v16 }
  0xf6   :  { %663 = vmatpush.bf16.xpose.msra.mxu0 %v736_v56  ;;  %677 = vmatpush.bf16.xpose.msra.mxu1 %v740_v30 }
  0xfe   :  { %664 = vmatpush.bf16.xpose.msra.mxu0 %v728_v46  ;;  %678 = vmatpush.bf16.xpose.msra.mxu1 %v732_v25 }
 0x105   :  { %665 = vmatmul.bf16.vlgmr.msra.gmra.mxu0 %v720_v39  ;;  %679 = vmatmul.bf16.vlgmr.msra.gmra.mxu1 %v724_v50 }
 0x182   :  { %v666_v10 = vpop.f32.mrf.mxu0  ;;  %v680_v43 = vpop.f32.mrf.mxu1 }
 0x183   :  { %v681_v15 = vadd.f32 %v680_v43, %v666_v10 }
 0x185   :  { %694 = vst [vmem:[#allocation4] sm:$0xff] %v681_v15 }
 0x18a   :  { %v668_v26 = vpop.f32.mrf.mxu0  ;;  %v682_v19 = vpop.f32.mrf.mxu1 }
 0x18b   :  { %v683_v32 = vadd.f32 %v682_v19, %v668_v26 }
 0x18d   :  { %695 = vst [vmem:[#allocation4 + $0x8] sm:$0xff] %v683_v32 }
 0x18e   :  { %708 = dma.vmem_to_hbm [thread:$0]  %s701_s19, 256, %s703_s22, [#allocation5], %s860_s3, %s860_s3, %s861_s23  }
 0x18f   :  { %853 = dma.done.wait [#allocation5], 256  }
 0x190   :  { %854 = vsyncadd [#allocation5], 4294967040 }
 0x191   :  { %713 = vsyncpa [#allocation5], 1 }

</bundles_post_ra>
